<compile_context>
chip_gen: v7x
topology: tpu7x:2x2x1
jax: 0.10.0
libtpu: 0.0.40
codegen_flags: <defaults>
</compile_context>

<pallas_src>
import functools

import jax
import jax.numpy as jnp
from jax.experimental import pallas as pl
from jax.experimental.pallas import tpu as pltpu


def _round_up(x, m):
    return (x + m - 1) // m * m


def _pick_tile_s(s, c_total, k_total, itemsize=4):
    """Pick a lane-dim (spatial) tile: as large as a conservative VMEM budget allows."""
    s_pad = _round_up(s, 128)
    budget = 24 * 1024 * 1024  # conservative: fits default scoped VMEM and v7x's 64 MiB
    # double-buffered x_r + x_i input blocks and the (2K)-row output block
    bytes_per_col = itemsize * 2 * (2 * c_total + 2 * k_total)
    max_tile = max(128, (budget // max(bytes_per_col, 1)) // 128 * 128)
    return int(min(s_pad, max_tile, 4096))


def _tri_conv_kernel(wa_ref, wb_ref, xr_ref, xi_ref, o_ref):
    # wa/wb: (2K, C) f32 (resident), xr/xi: (1, C, tile_s) f32, o: (1, 2K, tile_s) f32
    acc = jnp.dot(wa_ref[...], xr_ref[0], preferred_element_type=jnp.float32)
    acc = acc + jnp.dot(wb_ref[...], xi_ref[0], preferred_element_type=jnp.float32)
    o_ref[0] = acc.astype(o_ref.dtype)


def full_triangular_weight(group_params, total_in_channels):
    """Assemble the block-lower-triangular (K_total, C_total) complex weight
    (equivalent of TriangularComplexConv2d.full_weights(), with the 1x1 spatial
    dims squeezed)."""
    blocks = []
    for w in group_params:
        w2 = jnp.asarray(w)
        if w2.ndim == 4:  # (k, c, 1, 1)
            w2 = w2[:, :, 0, 0]
        k, c = w2.shape
        if k == 0:
            continue
        if c < total_in_channels:
            w2 = jnp.pad(w2, ((0, 0), (0, total_in_channels - c)))
        blocks.append(w2)
    if not blocks:
        return jnp.zeros((0, total_in_channels), dtype=jnp.complex64)
    return jnp.concatenate(blocks, axis=0)


@jax.jit
def triangular_complex_conv2d(x, w_full):
    """x: (B, C_total, H, W) complex64 (or real, cast to complex).
    w_full: (K_total, C_total) complex64 block-lower-triangular weight.
    Returns y: (B, K_total, H, W) complex64."""
    x = x.astype(jnp.complex64)
    w_full = w_full.astype(jnp.complex64)

    B, C, H, W = x.shape
    K = w_full.shape[0]
    if K == 0:  # mirrors the torch conv2d() empty-weight path
        return jnp.zeros((B, 0, H, W), dtype=jnp.complex64)
    S = H * W

    # Real/imag planes; spatial stays on the (lane) last axis — no layout transpose.
    x_r = jnp.real(x).astype(jnp.float32).reshape(B, C, S)
    x_i = jnp.imag(x).astype(jnp.float32).reshape(B, C, S)
    w_r = jnp.real(w_full).astype(jnp.float32)
    w_i = jnp.imag(w_full).astype(jnp.float32)

    # Packed real weights:
    #   y_packed[:K] = y_r = w_r @ x_r - w_i @ x_i
    #   y_packed[K:] = y_i = w_i @ x_r + w_r @ x_i
    wa = jnp.concatenate([w_r, w_i], axis=0)    # (2K, C), multiplies x_r
    wb = jnp.concatenate([-w_i, w_r], axis=0)   # (2K, C), multiplies x_i

    tile_s = _pick_tile_s(S, C, K)
    s_pad = _round_up(S, tile_s)
    if s_pad != S:
        pad = ((0, 0), (0, 0), (0, s_pad - S))
        x_r = jnp.pad(x_r, pad)
        x_i = jnp.pad(x_i, pad)

    two_k = 2 * K
    grid = (B, s_pad // tile_s)

    y_packed = pl.pallas_call(
        _tri_conv_kernel,
        out_shape=jax.ShapeDtypeStruct((B, two_k, s_pad), jnp.float32),
        grid_spec=pltpu.PrefetchScalarGridSpec(
            num_scalar_prefetch=0,
            grid=grid,
            in_specs=[
                # weights: constant block index -> DMA'd once, resident in VMEM
                pl.BlockSpec((two_k, C), lambda b, s: (0, 0)),
                pl.BlockSpec((two_k, C), lambda b, s: (0, 0)),
                # activations: one batch row, full channels, spatial tile on lanes
                pl.BlockSpec((1, C, tile_s), lambda b, s: (b, 0, s)),
                pl.BlockSpec((1, C, tile_s), lambda b, s: (b, 0, s)),
            ],
            out_specs=pl.BlockSpec((1, two_k, tile_s), lambda b, s: (b, 0, s)),
        ),
        compiler_params=pltpu.CompilerParams(
            dimension_semantics=("parallel", "parallel")),
    )(wa, wb, x_r, x_i)

    y_packed = y_packed[:, :, :S]
    y = jax.lax.complex(y_packed[:, :K, :], y_packed[:, K:, :])
    return y.reshape(B, K, H, W)


if __name__ == "__main__":
    key = jax.random.PRNGKey(0)

    # Small shapes consistent with the module: SplitTensorType with two groups.
    B, H, W = 2, 16, 16
    in_groups = [2, 2]     # input channels per group  -> C_total = 4
    out_groups = [2, 2]    # output channels per group -> K_total = 4
    C_total = sum(in_groups)

    keys = jax.random.split(key, 2 + 2 * len(in_groups))

    # Complex input (B, C_total, H, W)
    xr = jax.random.normal(keys[0], (B, C_total, H, W), dtype=jnp.float32)
    xi = jax.random.normal(keys[1], (B, C_total, H, W), dtype=jnp.float32)
    x = jax.lax.complex(xr, xi)

    # Per-group complex weights: group g's ComplexConv2d sees the *cumulative*
    # input channels up to and including group g (block-lower-triangular structure).
    group_params = []
    cum_in = 0
    for g, (cin, kout) in enumerate(zip(in_groups, out_groups)):
        cum_in += cin
        wr = jax.random.normal(keys[2 + 2 * g], (kout, cum_in), dtype=jnp.float32)
        wi = jax.random.normal(keys[3 + 2 * g], (kout, cum_in), dtype=jnp.float32)
        group_params.append(jax.lax.complex(wr, wi))

    w_full = full_triangular_weight(group_params, C_total)  # (K_total, C_total) complex

    y = triangular_complex_conv2d(x, w_full)
    y = jax.block_until_ready(y)

    # Pure-JAX reference of the block-triangular 1x1 complex conv.
    y_ref = jnp.einsum("kc,bchw->bkhw", w_full, x)

    err = float(jnp.max(jnp.abs(y - y_ref)))
    scale = float(jnp.max(jnp.abs(y_ref))) + 1e-6
    assert err <= 2e-2 * scale, f"mismatch: max abs err {err} vs scale {scale}"

    print("KERNEL_OK")
</pallas_src>

<mosaic_0001>
module attributes {stable_mosaic.version = 11 : i64} {
  func.func @_tri_conv_kernel(%arg0: i32, %arg1: i32, %arg2: memref<8x4xf32, #tpu.memory_space<vmem>>, %arg3: memref<8x4xf32, #tpu.memory_space<vmem>>, %arg4: memref<1x4x256xf32, #tpu.memory_space<vmem>>, %arg5: memref<1x4x256xf32, #tpu.memory_space<vmem>>, %arg6: memref<1x8x256xf32, #tpu.memory_space<vmem>>) attributes {dimension_semantics = [#tpu.dimension_semantics<parallel>, #tpu.dimension_semantics<parallel>], iteration_bounds = array<i64: 2, 1>, scalar_prefetch = 0 : i64, scratch_operands = 0 : i64, tpu.core_type = #tpu.core_type<tc>, window_params = [{pipeline_mode = #tpu.pipeline_mode<synchronous>, transform_indices = @transform_0, window_bounds = array<i64: 8, 4>}, {pipeline_mode = #tpu.pipeline_mode<synchronous>, transform_indices = @transform_1, window_bounds = array<i64: 8, 4>}, {transform_indices = @transform_2, window_bounds = array<i64: 1, 4, 256>}, {transform_indices = @transform_3, window_bounds = array<i64: 1, 4, 256>}, {transform_indices = @transform_4, window_bounds = array<i64: 1, 8, 256>}]} {
    %c0 = arith.constant 0 : index
    %c0_0 = arith.constant 0 : index
    %0 = vector.load %arg2[%c0, %c0_0] : memref<8x4xf32, #tpu.memory_space<vmem>>, vector<8x4xf32>
    %c0_1 = arith.constant 0 : index
    %c0_2 = arith.constant 0 : index
    %c0_3 = arith.constant 0 : index
    %1 = vector.load %arg4[%c0_1, %c0_2, %c0_3] : memref<1x4x256xf32, #tpu.memory_space<vmem>>, vector<1x4x256xf32>
    %2 = vector.shape_cast %1 : vector<1x4x256xf32> to vector<4x256xf32>
    %cst = arith.constant dense<0.000000e+00> : vector<8x256xf32>
    %3 = tpu.matmul %0, %2, %cst {dimension_numbers = #tpu.dot_dimension_numbers<[1], [0], [0], [1], [0, 0, 1, 1], [], []>} : vector<8x4xf32>, vector<4x256xf32>, vector<8x256xf32> -> vector<8x256xf32>
    %c0_4 = arith.constant 0 : index
    %c0_5 = arith.constant 0 : index
    %4 = vector.load %arg3[%c0_4, %c0_5] : memref<8x4xf32, #tpu.memory_space<vmem>>, vector<8x4xf32>
    %c0_6 = arith.constant 0 : index
    %c0_7 = arith.constant 0 : index
    %c0_8 = arith.constant 0 : index
    %5 = vector.load %arg5[%c0_6, %c0_7, %c0_8] : memref<1x4x256xf32, #tpu.memory_space<vmem>>, vector<1x4x256xf32>
    %6 = vector.shape_cast %5 : vector<1x4x256xf32> to vector<4x256xf32>
    %cst_9 = arith.constant dense<0.000000e+00> : vector<8x256xf32>
    %7 = tpu.matmul %4, %6, %cst_9 {dimension_numbers = #tpu.dot_dimension_numbers<[1], [0], [0], [1], [0, 0, 1, 1], [], []>} : vector<8x4xf32>, vector<4x256xf32>, vector<8x256xf32> -> vector<8x256xf32>
    %8 = arith.addf %3, %7 : vector<8x256xf32>
    %c0_10 = arith.constant 0 : index
    %c0_11 = arith.constant 0 : index
    %c0_12 = arith.constant 0 : index
    %9 = vector.load %arg6[%c0_10, %c0_11, %c0_12] : memref<1x8x256xf32, #tpu.memory_space<vmem>>, vector<1x8x256xf32>
    %10 = vector.shape_cast %9 : vector<1x8x256xf32> to vector<8x256xf32>
    %11 = vector.shape_cast %8 : vector<8x256xf32> to vector<1x8x256xf32>
    tpu.vector_store %arg6[%c0_10, %c0_11, %c0_12], %11 {strides = array<i32>} : memref<1x8x256xf32, #tpu.memory_space<vmem>>, vector<1x8x256xf32>,
    return
  }
  func.func @transform_0(%arg0: i32, %arg1: i32) -> (i32, i32) {
    %c0_i32 = arith.constant 0 : i32
    %c0_i32_0 = arith.constant 0 : i32
    %c0_i32_1 = arith.constant 0 : i32
    return %c0_i32, %c0_i32_0 : i32, i32
  }
  func.func @transform_1(%arg0: i32, %arg1: i32) -> (i32, i32) {
    %c0_i32 = arith.constant 0 : i32
    %c0_i32_0 = arith.constant 0 : i32
    %c0_i32_1 = arith.constant 0 : i32
    return %c0_i32, %c0_i32_0 : i32, i32
  }
  func.func @transform_2(%arg0: i32, %arg1: i32) -> (i32, i32, i32) {
    %c0_i32 = arith.constant 0 : i32
    %c0_i32_0 = arith.constant 0 : i32
    return %arg0, %c0_i32, %arg1 : i32, i32, i32
  }
  func.func @transform_3(%arg0: i32, %arg1: i32) -> (i32, i32, i32) {
    %c0_i32 = arith.constant 0 : i32
    %c0_i32_0 = arith.constant 0 : i32
    return %arg0, %c0_i32, %arg1 : i32, i32, i32
  }
  func.func @transform_4(%arg0: i32, %arg1: i32) -> (i32, i32, i32) {
    %c0_i32 = arith.constant 0 : i32
    %c0_i32_0 = arith.constant 0 : i32
    return %arg0, %c0_i32, %arg1 : i32, i32, i32
  }
}

</mosaic_0001>

<bundles_post_ra>
// kernel: custom-call.1
= control target key start
LH: loop header
LB: loop body
LE: loop exit
PB: predicated region body
PF: predicated region fallthrough
CT: control target
= control target key end

     0   :  { %s59_s0 = inlined_call_operand.hbm [shape: c64[4,4], index: 0, kind: input, shape index: {}]   ;;  %s60_s1 = inlined_call_operand.vmem [shape: f32[4,4], index: 1, kind: output, shape index: {}]  }
   0x1   :  { %s2_s8 = scalar_lea.hbm %s59_s0, 64 }
   0x2   :  { %3 = vsyncpa [#allocation0], 0  ;;  %s4_s11 = sshll.u32 %s60_s1, 4  ;;  %s34_s14 = scalar_lea.hbm %s59_s0, 128  ;;  %s5_s11 = int_to_ptr.vmem [resolvable:$true] %s4_s11 }
   0x3   :  { %p11_p0 = scmp.ne.s32.totalorder %s2_s8, %s34_s14  ;;  %p13_p1 = scmp.lt.u32.totalorder %s2_s8, %s59_s0 }
   0x4   :  { %p14_p2 = scmp.lt.u32.totalorder %s34_s14, %s34_s14  ;;  %p16_p4 = scmp.lt.u32.totalorder %s34_s14, %s2_s8 }
   0x6   :  { %p15_p3 = por %p14_p2, %p13_p1 }
   0x8   :  { %p17_p5 = por %p16_p4, %p15_p3 }
   0xa   :  { %p18_p6 = pnand %p17_p5, %p11_p0 }
   0xc   :  { %21 = shalt.err (!%p18_p6)  }
   0xd   :  { %s22_s17 = scalar_lea.vmem %s5_s11, 64  ;;  %p27_p8 = scmp.lt.s32.totalorder %s5_s11, %s5_s11 }
   0xe   :  { %p23_p7 = scmp.ne.s32.totalorder %s5_s11, %s22_s17  ;;  %p28_p9 = scmp.lt.s32.totalorder %s22_s17, %s22_s17 }
  0x10   :  { %p29_p10 = por %p28_p9, %p27_p8 }
  0x12   :  { %p30_p11 = pnand %p29_p10, %p23_p7 }
  0x14   :  { %33 = shalt.err (!%p30_p11)  }
  0x15   :  { %7 = dma.hbm_to_vmem [thread:$0]  %s2_s8, 64, %s5_s11, [#allocation0] }
  0x16   :  { %35 = dma.done.wait [#allocation0], 64  }
  0x17   :  { %36 = vsyncadd [#allocation0], 4294967232 }
  0x18   :  { %9 = vsyncpa [#allocation0], 1 }

// kernel: custom-call
= control target key start
LH: loop header
LB: loop body
LE: loop exit
PB: predicated region body
PF: predicated region fallthrough
CT: control target
= control target key end

     0   :  { %2 = vsyncpa [#allocation0], 0  ;;  %s61_s0 = inlined_call_operand.hbm [shape: c64[4,4], index: 0, kind: input, shape index: {}]   ;;  %s62_s1 = inlined_call_operand.vmem [shape: f32[4,4], index: 1, kind: output, shape index: {}]  }
   0x1   :  { %s3_s8 = sshll.u32 %s62_s1, 4  ;;  %s9_s11 = scalar_lea.hbm %s61_s0, 64  ;;  %s4_s8 = int_to_ptr.vmem [resolvable:$true] %s3_s8 }
   0x2   :  { %p10_p0 = scmp.ne.s32.totalorder %s61_s0, %s9_s11  ;;  %s11_s16 = scalar_lea.hbm %s61_s0, 128 }
   0x3   :  { %p12_p1 = scmp.lt.u32.totalorder %s11_s16, %s9_s11  ;;  %p13_p2 = scmp.lt.u32.totalorder %s9_s11, %s61_s0 }
   0x5   :  { %p14_p3 = por %p13_p2, %p12_p1 }
   0x7   :  { %p15_p4 = pnand %p14_p3, %p10_p0 }
   0x9   :  { %18 = shalt.err (!%p15_p4)  }
   0xa   :  { %s19_s1 = scalar_lea.vmem %s4_s8, 64  ;;  %p24_p6 = scmp.lt.s32.totalorder %s4_s8, %s4_s8 }
   0xb   :  { %p20_p5 = scmp.ne.s32.totalorder %s4_s8, %s19_s1  ;;  %p25_p7 = scmp.lt.s32.totalorder %s19_s1, %s19_s1 }
   0xd   :  { %p26_p8 = por %p25_p7, %p24_p6 }
   0xf   :  { %p27_p9 = pnand %p26_p8, %p20_p5 }
  0x11   :  { %30 = shalt.err (!%p27_p9)  }
  0x12   :  { %6 = dma.hbm_to_vmem [thread:$0]  %s61_s0, 64, %s4_s8, [#allocation0] }
  0x13   :  { %31 = dma.done.wait [#allocation0], 64  }
  0x14   :  { %32 = vsyncadd [#allocation0], 4294967232 }
  0x15   :  { %8 = vsyncpa [#allocation0], 1 }

// kernel: neg.1
= control target key start
LH: loop header
LB: loop body
LE: loop exit
PB: predicated region body
PF: predicated region fallthrough
CT: control target
= control target key end

     0   :  { %s24_s0 = inlined_call_operand.vmem [shape: f32[4,4], index: 0, kind: input, shape index: {}]   ;;  %s25_s1 = inlined_call_operand.vmem [shape: f32[4,4], index: 1, kind: output, shape index: {}]  }
   0x1   :  { %v2_v0 = vld [vmem:[%s24_s0] sm:$0xf] }
   0x2   :  { %v5_v1 = vxor.u32 2147483648, %v2_v0 }
   0x4   :  { %7 = vst [vmem:[%s25_s1] sm:$0xf] %v5_v1 }

// kernel: custom-call.3
= control target key start
LH: loop header
LB: loop body
LE: loop exit
PB: predicated region body
PF: predicated region fallthrough
CT: control target
= control target key end

     0   :  { %s59_s0 = inlined_call_operand.hbm [shape: c64[2,4,16,16], index: 0, kind: input, shape index: {}]   ;;  %s60_s1 = inlined_call_operand.vmem [shape: f32[2,4,16,16], index: 1, kind: output, shape index: {}]  }
   0x1   :  { %s2_s8 = scalar_lea.hbm %s59_s0, 2048 }
   0x2   :  { %3 = vsyncpa [#allocation0], 0  ;;  %s4_s11 = sshll.u32 %s60_s1, 4  ;;  %s34_s14 = scalar_lea.hbm %s59_s0, 4096  ;;  %s5_s11 = int_to_ptr.vmem [resolvable:$true] %s4_s11 }
   0x3   :  { %p11_p0 = scmp.ne.s32.totalorder %s2_s8, %s34_s14  ;;  %p13_p1 = scmp.lt.u32.totalorder %s2_s8, %s59_s0 }
   0x4   :  { %p14_p2 = scmp.lt.u32.totalorder %s34_s14, %s34_s14  ;;  %p16_p4 = scmp.lt.u32.totalorder %s34_s14, %s2_s8 }
   0x6   :  { %p15_p3 = por %p14_p2, %p13_p1 }
   0x8   :  { %p17_p5 = por %p16_p4, %p15_p3 }
   0xa   :  { %p18_p6 = pnand %p17_p5, %p11_p0 }
   0xc   :  { %21 = shalt.err (!%p18_p6)  }
   0xd   :  { %s22_s17 = scalar_lea.vmem %s5_s11, 2048  ;;  %p27_p8 = scmp.lt.s32.totalorder %s5_s11, %s5_s11 }
   0xe   :  { %p23_p7 = scmp.ne.s32.totalorder %s5_s11, %s22_s17  ;;  %p28_p9 = scmp.lt.s32.totalorder %s22_s17, %s22_s17 }
  0x10   :  { %p29_p10 = por %p28_p9, %p27_p8 }
  0x12   :  { %p30_p11 = pnand %p29_p10, %p23_p7 }
  0x14   :  { %33 = shalt.err (!%p30_p11)  }
  0x15   :  { %7 = dma.hbm_to_vmem [thread:$0]  %s2_s8, 2048, %s5_s11, [#allocation0] }
  0x16   :  { %35 = dma.done.wait [#allocation0], 2048  }
  0x17   :  { %36 = vsyncadd [#allocation0], 4294965248 }
  0x18   :  { %9 = vsyncpa [#allocation0], 1 }

// kernel: custom-call.2
= control target key start
LH: loop header
LB: loop body
LE: loop exit
PB: predicated region body
PF: predicated region fallthrough
CT: control target
= control target key end

     0   :  { %2 = vsyncpa [#allocation0], 0  ;;  %s61_s0 = inlined_call_operand.hbm [shape: c64[2,4,16,16], index: 0, kind: input, shape index: {}]   ;;  %s62_s1 = inlined_call_operand.vmem [shape: f32[2,4,16,16], index: 1, kind: output, shape index: {}]  }
   0x1   :  { %s3_s8 = sshll.u32 %s62_s1, 4  ;;  %s9_s11 = scalar_lea.hbm %s61_s0, 2048  ;;  %s4_s8 = int_to_ptr.vmem [resolvable:$true] %s3_s8 }
   0x2   :  { %p10_p0 = scmp.ne.s32.totalorder %s61_s0, %s9_s11  ;;  %s11_s16 = scalar_lea.hbm %s61_s0, 4096 }
   0x3   :  { %p12_p1 = scmp.lt.u32.totalorder %s11_s16, %s9_s11  ;;  %p13_p2 = scmp.lt.u32.totalorder %s9_s11, %s61_s0 }
   0x5   :  { %p14_p3 = por %p13_p2, %p12_p1 }
   0x7   :  { %p15_p4 = pnand %p14_p3, %p10_p0 }
   0x9   :  { %18 = shalt.err (!%p15_p4)  }
   0xa   :  { %s19_s1 = scalar_lea.vmem %s4_s8, 2048  ;;  %p24_p6 = scmp.lt.s32.totalorder %s4_s8, %s4_s8 }
   0xb   :  { %p20_p5 = scmp.ne.s32.totalorder %s4_s8, %s19_s1  ;;  %p25_p7 = scmp.lt.s32.totalorder %s19_s1, %s19_s1 }
   0xd   :  { %p26_p8 = por %p25_p7, %p24_p6 }
   0xf   :  { %p27_p9 = pnand %p26_p8, %p20_p5 }
  0x11   :  { %30 = shalt.err (!%p27_p9)  }
  0x12   :  { %6 = dma.hbm_to_vmem [thread:$0]  %s61_s0, 2048, %s4_s8, [#allocation0] }
  0x13   :  { %31 = dma.done.wait [#allocation0], 2048  }
  0x14   :  { %32 = vsyncadd [#allocation0], 4294965248 }
  0x15   :  { %8 = vsyncpa [#allocation0], 1 }

// kernel: custom-call.4
= control target key start
LH: loop header
LB: loop body
LE: loop exit
PB: predicated region body
PF: predicated region fallthrough
CT: control target
= control target key end

     0   :  { %s126_s0 = inlined_call_operand.vmem [shape: f32[2,4,16,16], index: 0, kind: input, shape index: {}]   ;;  %s127_s1 = inlined_call_operand.vmem [shape: f32[2,4,16,16], index: 1, kind: input, shape index: {}]   ;;  %s128_s2 = inlined_call_operand.hbm [shape: c64[2,4,16,16], index: 2, kind: output, shape index: {}]  }
   0x1   :  { %s87_s11 = scalar_lea.hbm %s128_s2, 2048 }
   0x2   :  { %4 = vsyncpa [#allocation0], 0  ;;  %s5_s14 = sshll.u32 %s126_s0, 4  ;;  %s6_s14 = int_to_ptr.vmem [resolvable:$true] %s5_s14 }
   0x3   :  { %s18_s15 = scalar_lea.vmem %s6_s14, 2048  ;;  %p23_p1 = scmp.lt.s32.totalorder %s6_s14, %s6_s14 }
   0x4   :  { %p19_p0 = scmp.ne.s32.totalorder %s6_s14, %s18_s15  ;;  %p24_p2 = scmp.lt.s32.totalorder %s18_s15, %s18_s15 }
   0x6   :  { %p25_p3 = por %p24_p2, %p23_p1 }
   0x8   :  { %p26_p4 = pnand %p25_p3, %p19_p0 }
   0xa   :  { %29 = shalt.err (!%p26_p4)  }
   0xb   :  { %p31_p5 = scmp.ne.s32.totalorder %s128_s2, %s87_s11  ;;  %s32_s0 = scalar_lea.hbm %s128_s2, 4096 }
   0xc   :  { %p33_p6 = scmp.lt.u32.totalorder %s32_s0, %s87_s11  ;;  %p34_p7 = scmp.lt.u32.totalorder %s87_s11, %s128_s2 }
   0xe   :  { %p35_p8 = por %p34_p7, %p33_p6 }
  0x10   :  { %p36_p9 = pnand %p35_p8, %p31_p5 }
  0x12   :  { %39 = shalt.err (!%p36_p9)  }
  0x13   :  { %8 = dma.vmem_to_hbm [thread:$0]  %s6_s14, 2048, %s128_s2, [#allocation0] }
  0x14   :  { %65 = dma.done.wait [#allocation0], 2048  }
  0x15   :  { %66 = vsyncadd [#allocation0], 4294965248 }
  0x16   :  { %10 = vsyncpa [#allocation0], 1 }
  0x17   :  { %11 = vsyncpa [#allocation1], 0  ;;  %s12_s28 = sshll.u32 %s127_s1, 4  ;;  %s13_s28 = int_to_ptr.vmem [resolvable:$true] %s12_s28 }
  0x18   :  { %s40_s29 = scalar_lea.vmem %s13_s28, 2048  ;;  %p45_p11 = scmp.lt.s32.totalorder %s13_s28, %s13_s28 }
  0x19   :  { %p41_p10 = scmp.ne.s32.totalorder %s13_s28, %s40_s29  ;;  %p46_p12 = scmp.lt.s32.totalorder %s40_s29, %s40_s29 }
  0x1b   :  { %p47_p13 = por %p46_p12, %p45_p11 }
  0x1d   :  { %p48_p0 = pnand %p47_p13, %p41_p10 }
  0x1f   :  { %51 = shalt.err (!%p48_p0)  }
  0x20   :  { %p53_p1 = scmp.ne.s32.totalorder %s87_s11, %s32_s0  ;;  %p56_p2 = scmp.lt.u32.totalorder %s32_s0, %s32_s0 }
  0x22   :  { %p57_p3 = por %p56_p2, %p34_p7 }
  0x24   :  { %p59_p4 = por %p57_p3, %p33_p6 }
  0x26   :  { %p60_p5 = pnand %p59_p4, %p53_p1 }
  0x28   :  { %63 = shalt.err (!%p60_p5)  }
  0x29   :  { %15 = dma.vmem_to_hbm [thread:$0]  %s13_s28, 2048, %s87_s11, [#allocation1] }
  0x2a   :  { %67 = dma.done.wait [#allocation1], 2048  }
  0x2b   :  { %68 = vsyncadd [#allocation1], 4294965248 }
  0x2c   :  { %17 = vsyncpa [#allocation1], 1 }

// kernel: triangular_complex_conv2d.1
= control target key start
LH: loop header
LB: loop body
LE: loop exit
PB: predicated region body
PF: predicated region fallthrough
CT: control target
= control target key end

     0   :  { %s647_s15 = smov 0   ;;  %s649_s16 = smov 0   ;;  %s689_s0 = inlined_call_operand.vmem [shape: f32[8,4], index: 0, kind: input, shape index: {}]   ;;  %s690_s1 = inlined_call_operand.vmem [shape: f32[8,4], index: 1, kind: input, shape index: {}]   ;;  %s691_s2 = inlined_call_operand.vmem [shape: f32[2,4,256], index: 2, kind: input, shape index: {}]   ;;  %s692_s3 = inlined_call_operand.vmem [shape: f32[2,4,256], index: 3, kind: input, shape index: {}]   ;;  %s693_s4 = inlined_call_operand.vmem [shape: f32[2,8,256], index: 4, kind: output, shape index: {}]  }
   0x1   :  { %s651_s17 = smov 0  }
   0x2 LB: > { %s26_s18 = sadd.s32 1, %s615_s16  ;;  %p550_p0 = scmp.ge.s32.totalorder %s619_s17, 1  ;;  %s619_s17 = sphi %s651_s17, %s14_s17   ;;  %s615_s16 = sphi %s649_s16, %s695_s16   ;;  %s611_s15 = sphi %s647_s15, %s694_s15  }
   0x3   : > { %p28_p1 = scmp.ge.s32.totalorder %s26_s18, 2  ;;  %p200_p2 = scmp.lt.s32.totalorder %s619_s17, 3 }
   0x5   : > { %s697_s18 = smov (%p28_p1, %s26_s18), 0  ;;  %p201_p3 = pnand %p550_p0, %p200_p2 }
   0x6   : > { %p244_p4 = scmp.lt.s32.totalorder (!%p201_p3), %s611_s15, 1  ;;  %v621_v0 = vmov (!%p201_p3), 0.0   ;;  %vm283_vm0 = vcmask (!%p201_p3), 1043456   ;;  %v275_v5 = vld [vmem:[%s690_s1] sm:$0xff] (!%p201_p3)  ;;  %vm279_vm1 = vcmask (!%p201_p3), 31744  }
   0x7   : > { %204 = sbr.rel (%p201_p3) target bundleno = 239 (0xef), region = 36  ;;  %352 = vmatprep.mubr.f32.mxu1 (!%p201_p3), %v621_v0  ;;  %432 = vmatprep.mubr.f32.mxu0 (!%p201_p3), %v621_v0  ;;  %v273_v6 = vld [vmem:[%s689_s0] sm:$0xff] (!%p201_p3) }
   0xe   : > { %s699_s15 = smov (!%p244_p4, %s611_s15), 1 }
   0xf   : > { %s565_s19 = sshll.u32 %s699_s15, 3  ;;  %s567_s30 = sshll.u32 %s699_s15, 4 }
  0x10   : > { %s261_s22 = scalar_lea.vmem %s692_s3, %s565_s19  ;;  %s251_s25 = scalar_lea.vmem %s691_s2, %s565_s19 }
  0x11   : > { %v276_v1 = vld [vmem:[%s261_s22] sm:$0xff]  ;;  %s271_s7 = scalar_lea.vmem %s693_s4, %s567_s30 }
  0x12   : > { %v274_v2 = vld [vmem:[%s251_s25] sm:$0xff]  ;;  %v278_v3 = vcombine.high %v276_v1, %v276_v1 }
  0x13   : > { %v360_v4 = vcombine.high %v274_v2, %v274_v2 }
  0x14   : > { %557 = vmatprep.subr.msk.mxu1 %vm283_vm0, %v278_v3 }
  0x15   : > { %560 = vmatprep.subr.msk.mxu0 %vm283_vm0, %v360_v4  ;;  %558 = vmatpush1.msk.msra.mxu1 %vm283_vm0, %v276_v1 }
  0x16   : > { %561 = vmatpush1.msk.msra.mxu0 %vm283_vm0, %v274_v2  ;;  %559 = vmatmul.mubr.msk.f32.vlgmr.msra.gmra.mrb[0].mxu1 %vm279_vm1, %v275_v5 }
  0x17   : > { %562 = vmatmul.mubr.msk.f32.vlgmr.msra.gmra.mrb[0].mxu0 %vm279_vm1, %v273_v6 }
  0xe9   : > { %v354_v7 = vpop.f32.mrb[0].mxu1 }
  0xea   : > { %v434_v8 = vpop.f32.mrb[0].mxu0  ;;  %v356_v10 = vpop.f32.mrb[1].mxu1 }
  0xeb   : > { %v435_v9 = vadd.f32 %v434_v8, %v354_v7  ;;  %v436_v11 = vpop.f32.mrb[1].mxu0 }
  0xec   : > { %v437_v12 = vadd.f32 %v436_v11, %v356_v10 }
  0xed   : > { %439 = vst [vmem:[%s271_s7] sm:$0xff] %v435_v9 }
  0xee   : > { %440 = vst [vmem:[%s271_s7 + $0x8] sm:$0xff] %v437_v12 }
  0xef PF: > { %s14_s17 = sadd.s32 1, %s619_s17   ;;  %s694_s15 = smov %s615_s16 }
  0xf0   : > { %p11_p5 = scmp.ge.s32.totalorder %s14_s17, 4   ;;  %s695_s16 = smov %s697_s18 }
  0xf2   :  { %13 = sbr.rel (!%p11_p5) target bundleno = 2 (0x2), region = 69 }

</bundles_post_ra>
